<compile_context>
chip_gen: v7x
topology: tpu7x:2x2x1
jax: 0.10.0
libtpu: 0.0.40
codegen_flags: <defaults>
</compile_context>

<pallas_src>
import math

import jax
import jax.numpy as jnp
from jax.experimental import pallas as pl
from jax.experimental.pallas import tpu as pltpu

N = 10
IN_F = 2 * N      # 20
HID_F = 4 * N     # 40
OUT_F = 1
EPS = 1e-12       # guards log(|x|) at exactly 0  (Python float -> jaxpr literal)
PI = math.pi      # Python float -> jaxpr literal (NOT a captured jnp constant)


def _round_up(x, m):
    return ((x + m - 1) // m) * m


def _hybrid_kernel(xt_ref, w1t_ref, w2t_ref, b2_ref, o_ref):
    # xt : (IN_F, TB) -- batch on the lane axis -> near-full VPU/EUP utilization
    xt = xt_ref[...]
    w1t = w1t_ref[...]          # (HID_F, IN_F)  VMEM-resident across grid steps
    w2t = w2t_ref[...]          # (OUT_F, HID_F) VMEM-resident across grid steps

    # ---- PUNN inputs: log-magnitude and (pi-prescaled) negative indicator ----
    log_abs = jnp.log(jnp.abs(xt) + EPS)                           # (IN_F, TB) EUP
    phase_in = jnp.where(xt < 0.0, PI, 0.0).astype(xt.dtype)       # (IN_F, TB) VALU

    # ---- two small MXU matmuls (no concat/slice copies) ----
    z = jnp.dot(w1t, log_abs, preferred_element_type=jnp.float32)        # (HID_F, TB)
    phase = jnp.dot(w1t, phase_in, preferred_element_type=jnp.float32)   # (HID_F, TB)

    # ---- PUNN nonlinearity + OReLU (ReLU) ----
    # TODO(synk): if precision budget allows, replace jnp.cos with a bounded-range
    # polynomial (|phase| <= pi * max_j sum_i |w1_ij|) to cut the binding VALU slot.
    h = jnp.maximum(jnp.exp(z) * jnp.cos(phase), 0.0)              # (HID_F, TB)

    # ---- Linear(4n, 1): lane-dense (OUT_F, TB) result, scalar bias from SMEM ----
    y = jnp.dot(w2t, h, preferred_element_type=jnp.float32)        # (OUT_F, TB)
    o_ref[...] = (y + b2_ref[0, 0]).astype(o_ref.dtype)


def hybrid_forward(x, w1, w2, b2, *, tb=8192, x_transposed=False):
    """Fused Hybrid forward.

    x : (B, 2n) f32, or (2n, B) when x_transposed=True (skips the extra HBM
        transpose pass -- worthwhile on v5e).
    w1: (2n, 4n), w2: (4n, 1), b2: (1,).  Returns (B, 1).
    """
    if x_transposed:
        xt = x.astype(jnp.float32)                                 # (IN_F, B)
        B = xt.shape[1]
    else:
        B = x.shape[0]
        xt = x.astype(jnp.float32).T                               # (IN_F, B)

    # Large lane-aligned batch tile (amortizes per-step overhead), but capped so
    # the 1-D grid keeps >= 2 steps when B allows (v7x megacore sharding).
    B128 = _round_up(max(B, 1), 128)
    TB = min(_round_up(tb, 128), B128)
    if B128 >= 256:
        TB = min(TB, _round_up((B128 + 1) // 2, 128))
    B_pad = _round_up(B, TB)

    if B_pad != B:
        # pad with 1.0: log(1)=0, indicator=0 -> benign rows, discarded at the end
        xt = jnp.pad(xt, ((0, 0), (0, B_pad - B)), constant_values=1.0)

    w1t = w1.astype(jnp.float32).T                                 # (HID_F, IN_F)
    w2t = w2.astype(jnp.float32).T                                 # (OUT_F, HID_F)
    b2_2d = jnp.reshape(b2, (1, 1)).astype(jnp.float32)

    # Advisory cost for XLA scheduling of the surrounding transpose/pad/slice.
    cost = pl.CostEstimate(
        flops=2 * (2 * HID_F * IN_F + HID_F * OUT_F) * B_pad,
        transcendentals=(IN_F + 2 * HID_F) * B_pad,
        bytes_accessed=(IN_F + OUT_F) * 4 * B_pad
        + 4 * (IN_F * HID_F + HID_F * OUT_F + 1),
    )

    out_t = pl.pallas_call(
        _hybrid_kernel,
        out_shape=jax.ShapeDtypeStruct((OUT_F, B_pad), jnp.float32),
        grid=(B_pad // TB,),
        in_specs=[
            pl.BlockSpec((IN_F, TB), lambda i: (0, i)),            # x tile over batch
            pl.BlockSpec((HID_F, IN_F), lambda i: (0, 0)),         # w1^T resident
            pl.BlockSpec((OUT_F, HID_F), lambda i: (0, 0)),        # w2^T resident
            pl.BlockSpec(memory_space=pltpu.MemorySpace.SMEM),     # scalar bias
        ],
        out_specs=pl.BlockSpec((OUT_F, TB), lambda i: (0, i)),
        compiler_params=pltpu.CompilerParams(
            dimension_semantics=("parallel",)),
        cost_estimate=cost,
    )(xt, w1t, w2t, b2_2d)

    return out_t[:, :B].T                                          # (B, 1)


def hybrid_reference(x, w1, w2, b2):
    log_abs = jnp.log(jnp.abs(x) + EPS)
    neg_ind = (x < 0.0).astype(jnp.float32)
    z = log_abs @ w1
    phase = math.pi * (neg_ind @ w1)
    h = jnp.maximum(jnp.exp(z) * jnp.cos(phase), 0.0)
    return h @ w2 + b2.reshape(1, 1)


if __name__ == "__main__":
    key = jax.random.PRNGKey(0)
    kx, kw1, kw2, kb2 = jax.random.split(key, 4)

    B = 8
    # inputs in a range where products stay well-behaved (nonzero magnitudes)
    x = jax.random.uniform(kx, (B, IN_F), jnp.float32, minval=-2.0, maxval=2.0)
    x = jnp.where(jnp.abs(x) < 0.1, 0.1, x)

    # PUNN exponents: small values keep exp() in range
    w1 = 0.1 * jax.random.normal(kw1, (IN_F, HID_F), jnp.float32)
    # Linear(4n, 1): PyTorch-style uniform(-1/sqrt(fan_in), 1/sqrt(fan_in))
    bound = 1.0 / math.sqrt(HID_F)
    w2 = jax.random.uniform(kw2, (HID_F, OUT_F), jnp.float32, minval=-bound, maxval=bound)
    b2 = jax.random.uniform(kb2, (OUT_F,), jnp.float32, minval=-bound, maxval=bound)

    out = hybrid_forward(x, w1, w2, b2)
    out = jax.block_until_ready(out)

    ref = hybrid_reference(x, w1, w2, b2)
    assert out.shape == (B, 1), out.shape
    assert jnp.allclose(out, ref, atol=1e-4, rtol=1e-4), (out, ref)

    print("KERNEL_OK")
</pallas_src>

<mosaic_0001>
module attributes {stable_mosaic.version = 11 : i64} {
  func.func @_hybrid_kernel(%arg0: i32, %arg1: memref<20x128xf32, #tpu.memory_space<vmem>>, %arg2: memref<40x20xf32, #tpu.memory_space<vmem>>, %arg3: memref<1x40xf32, #tpu.memory_space<vmem>>, %arg4: memref<1x1xf32, #tpu.memory_space<smem>>, %arg5: memref<1x128xf32, #tpu.memory_space<vmem>>) attributes {dimension_semantics = [#tpu.dimension_semantics<parallel>], iteration_bounds = array<i64: 1>, scalar_prefetch = 0 : i64, scratch_operands = 0 : i64, tpu.core_type = #tpu.core_type<tc>, window_params = [{transform_indices = @transform_0, window_bounds = array<i64: 20, 128>}, {pipeline_mode = #tpu.pipeline_mode<synchronous>, transform_indices = @transform_1, window_bounds = array<i64: 40, 20>}, {pipeline_mode = #tpu.pipeline_mode<synchronous>, transform_indices = @transform_2, window_bounds = array<i64: 1, 40>}, {transform_indices = @transform_3, window_bounds = array<i64: 1, 1>}, {transform_indices = @transform_4, window_bounds = array<i64: 1, 128>}]} {
    %c0 = arith.constant 0 : index
    %c0_0 = arith.constant 0 : index
    %0 = vector.load %arg1[%c0, %c0_0] : memref<20x128xf32, #tpu.memory_space<vmem>>, vector<20x128xf32>
    %c0_1 = arith.constant 0 : index
    %c0_2 = arith.constant 0 : index
    %1 = vector.load %arg2[%c0_1, %c0_2] : memref<40x20xf32, #tpu.memory_space<vmem>>, vector<40x20xf32>
    %c0_3 = arith.constant 0 : index
    %c0_4 = arith.constant 0 : index
    %2 = vector.load %arg3[%c0_3, %c0_4] : memref<1x40xf32, #tpu.memory_space<vmem>>, vector<1x40xf32>
    %3 = math.absf %0 : vector<20x128xf32>
    %cst = arith.constant 9.99999996E-13 : f32
    %4 = vector.broadcast %cst : f32 to vector<20x128xf32>
    %5 = arith.addf %3, %4 : vector<20x128xf32>
    %6 = math.log %5 : vector<20x128xf32>
    %cst_5 = arith.constant 0.000000e+00 : f32
    %7 = vector.broadcast %cst_5 : f32 to vector<20x128xf32>
    %8 = arith.cmpf olt, %0, %7 : vector<20x128xf32>
    %cst_6 = arith.constant 3.14159274 : f32
    %cst_7 = arith.constant 0.000000e+00 : f32
    %9 = vector.broadcast %cst_6 : f32 to vector<20x128xf32>
    %10 = vector.broadcast %cst_7 : f32 to vector<20x128xf32>
    %11 = arith.select %8, %9, %10 : vector<20x128xi1>, vector<20x128xf32>
    %cst_8 = arith.constant dense<0.000000e+00> : vector<40x128xf32>
    %12 = tpu.matmul %1, %6, %cst_8 {dimension_numbers = #tpu.dot_dimension_numbers<[1], [0], [0], [1], [0, 0, 1, 1], [], []>} : vector<40x20xf32>, vector<20x128xf32>, vector<40x128xf32> -> vector<40x128xf32>
    %cst_9 = arith.constant dense<0.000000e+00> : vector<40x128xf32>
    %13 = tpu.matmul %1, %11, %cst_9 {dimension_numbers = #tpu.dot_dimension_numbers<[1], [0], [0], [1], [0, 0, 1, 1], [], []>} : vector<40x20xf32>, vector<20x128xf32>, vector<40x128xf32> -> vector<40x128xf32>
    %14 = math.exp %12 : vector<40x128xf32>
    %15 = math.cos %13 : vector<40x128xf32>
    %16 = arith.mulf %14, %15 : vector<40x128xf32>
    %cst_10 = arith.constant 0.000000e+00 : f32
    %17 = vector.broadcast %cst_10 : f32 to vector<40x128xf32>
    %18 = arith.maximumf %16, %17 : vector<40x128xf32>
    %cst_11 = arith.constant dense<0.000000e+00> : vector<1x128xf32>
    %19 = tpu.matmul %2, %18, %cst_11 {dimension_numbers = #tpu.dot_dimension_numbers<[1], [0], [0], [1], [0, 0, 1, 1], [], []>} : vector<1x40xf32>, vector<40x128xf32>, vector<1x128xf32> -> vector<1x128xf32>
    %c0_12 = arith.constant 0 : index
    %c0_13 = arith.constant 0 : index
    %20 = memref.load %arg4[%c0_12, %c0_13] : memref<1x1xf32, #tpu.memory_space<smem>>
    %21 = vector.broadcast %20 : f32 to vector<1x128xf32>
    %22 = arith.addf %19, %21 : vector<1x128xf32>
    %c0_14 = arith.constant 0 : index
    %c0_15 = arith.constant 0 : index
    %23 = vector.load %arg5[%c0_14, %c0_15] : memref<1x128xf32, #tpu.memory_space<vmem>>, vector<1x128xf32>
    tpu.vector_store %arg5[%c0_14, %c0_15], %22 {strides = array<i32>} : memref<1x128xf32, #tpu.memory_space<vmem>>, vector<1x128xf32>,
    return
  }
  func.func @transform_0(%arg0: i32) -> (i32, i32) {
    %c0_i32 = arith.constant 0 : i32
    %c0_i32_0 = arith.constant 0 : i32
    return %c0_i32, %arg0 : i32, i32
  }
  func.func @transform_1(%arg0: i32) -> (i32, i32) {
    %c0_i32 = arith.constant 0 : i32
    %c0_i32_0 = arith.constant 0 : i32
    %c0_i32_1 = arith.constant 0 : i32
    return %c0_i32, %c0_i32_0 : i32, i32
  }
  func.func @transform_2(%arg0: i32) -> (i32, i32) {
    %c0_i32 = arith.constant 0 : i32
    %c0_i32_0 = arith.constant 0 : i32
    %c0_i32_1 = arith.constant 0 : i32
    return %c0_i32, %c0_i32_0 : i32, i32
  }
  func.func @transform_3(%arg0: i32) -> (i32, i32) {
    %c0_i32 = arith.constant 0 : i32
    %c0_i32_0 = arith.constant 0 : i32
    %c0_i32_1 = arith.constant 0 : i32
    return %c0_i32, %c0_i32_0 : i32, i32
  }
  func.func @transform_4(%arg0: i32) -> (i32, i32) {
    %c0_i32 = arith.constant 0 : i32
    %c0_i32_0 = arith.constant 0 : i32
    return %c0_i32, %arg0 : i32, i32
  }
}

</mosaic_0001>

<bundles_post_ra>
// kernel: tpu_custom_call.1
= control target key start
LH: loop header
LB: loop body
LE: loop exit
PB: predicated region body
PF: predicated region fallthrough
CT: control target
= control target key end

     0   :  { %v1090_v2 = vmov 0.0|0.0   ;;  %v1091_v8 = vmov 3.140625|3.140625   ;;  %vm1092_vm3 = vmmov 0   ;;  %v1093_v10 = vmov 0.0   ;;  %s1595_s0 = inlined_call_operand.vmem [shape: f32[20,128], index: 0, kind: input, shape index: {}]   ;;  %s1596_s1 = inlined_call_operand.vmem [shape: f32[40,20], index: 1, kind: input, shape index: {}]   ;;  %s1597_s2 = inlined_call_operand.vmem [shape: f32[1,40], index: 2, kind: input, shape index: {}]   ;;  %s1598_s3 = inlined_call_operand.<no memory space> [shape: f32[1,1], index: 3, kind: input, shape index: {}]   ;;  %s1599_s4 = inlined_call_operand.hbm [shape: f32[1,128], index: 4, kind: output, shape index: {}]  }
   0x1   :  { %v19_v0 = vld [vmem:[%s1595_s0] sm:$0xff]  ;;  %v20_v1 = vld [vmem:[%s1595_s0 + $0x8] sm:$0xff]  ;;  %990 = vmatprep.subr.bf16.mxu1 %v1090_v2  ;;  %987 = vmatprep.subr.bf16.mxu0 %v1090_v2  ;;  %v21_v5 = vld [vmem:[%s1595_s0 + $0x10] sm:$0xf]  ;;  %vm62_vm5 = vcmask 1043456   ;;  %vm46_vm6 = vcmask 162816  }
   0x2   :  { %v28_v3 = vand.u32 2147483647, %v19_v0  ;;  %v29_v4 = vand.u32 2147483647, %v20_v1  ;;  %vm40_vm0 = vcmp.lt.f32.partialorder %v19_v0, 0.0  ;;  %vm41_vm1 = vcmp.lt.f32.partialorder %v20_v1, 0.0  ;;  %959 = vmatprep.mubr.msk.f32.mxu1 %vm1092_vm3, %v1093_v10  ;;  %938 = vmatprep.mubr.msk.f32.mxu0 %vm1092_vm3, %v1093_v10 }
   0x3   :  { %vm991_vm2 = vmpackc.low %vm41_vm1, %vm40_vm0  ;;  %v30_v9 = vand.u32 2147483647, %v21_v5  ;;  %vm42_vm4 = vcmp.lt.f32.partialorder %v21_v5, 0.0  ;;  %v22_v13 = vld [vmem:[%s1596_s1] sm:$0xff] }
   0x4   :  { %v31_v6 = vadd.f32 1e-12, %v28_v3  ;;  %v32_v7 = vadd.f32 1e-12, %v29_v4  ;;  %992 = vmatpush3.bf16.msk.msra.mxu1 %vm991_vm2, %v1091_v8  ;;  %v45_v12 = vsel %vm42_vm4, 3.1415927, %v1093_v10 }
   0x5   :  { %957 = vmatprep.subr.mxu1 %v1093_v10  ;;  %v33_v11 = vadd.f32 1e-12, %v30_v9 }
   0x6   :  { %1030 = vlog2.f32 %v31_v6 }
   0x7   :  { %1032 = vlog2.f32 %v32_v7 }
   0x8   :  { %10 = vsyncpa [#allocation4], 0  ;;  %958 = vmatpush3.msk.msra.mxu1 %vm62_vm5, %v45_v12  ;;  %1034 = vlog2.f32 %v33_v11  ;;  %v23_v14 = vld [vmem:[%s1596_s1 + $0x8] sm:$0xff]  ;;  %v24_v15 = vld [vmem:[%s1596_s1 + $0x10] sm:$0xff]  ;;  %v1094_v52 = vmov 683565275  }
   0x9   :  { %960 = vmatmul.mubr.msk.f32.vlgmr.msra.gmra.mrb[0].mxu1 %vm46_vm6, %v22_v13  ;;  %v25_v19 = vld [vmem:[%s1596_s1 + $0x18] sm:$0xff]  ;;  %v26_v23 = vld [vmem:[%s1596_s1 + $0x20] sm:$0xff]  ;;  %v1095_v54 = vmov 2475754826   ;;  %v1096_v58 = vmov 2131351028  }
   0xa   :  { %962 = vmatprep.mubr.msk.f32.mxu1 %vm1092_vm3, %v1093_v10  ;;  %v1097_v60 = vmov 2102212464   ;;  %v1098_v62 = vmov 920167782   ;;  %v1099_v6 = vmov 1326507024  }
   0xb   :  { %s1100_s7 = smov [#allocation3]  }
   0xc   :  { %s867_s8 = sshll.u32 %s1100_s7, 4  ;;  %s868_s8 = int_to_ptr.vmem [resolvable:$true] %s867_s8 }
   0xd   :  { %963 = vmatmul.mubr.msk.f32.gmra.mrb[2].mxu1 %vm46_vm6, %v23_v14  ;;  %s1066_s9 = scalar_lea.vmem %s868_s8, 16  ;;  %s1070_s10 = scalar_lea.vmem %s868_s8, 32 }
   0xe   :  { %965 = vmatprep.mubr.msk.f32.mxu1 %vm1092_vm3, %v1093_v10  ;;  %p1067_p0 = scmp.ne.s32.totalorder %s868_s8, %s1066_s9  ;;  %p1071_p1 = scmp.lt.s32.totalorder %s868_s8, %s868_s8 }
   0xf   :  { %p1072_p2 = scmp.lt.s32.totalorder %s1070_s10, %s1066_s9 }
  0x10   :  { %v1031_v16 = vpop.eup %1030 }
  0x11   :  { %v1033_v17 = vpop.eup %1032  ;;  %966 = vmatmul.mubr.msk.f32.gmra.mrb[4].mxu1 %vm46_vm6, %v24_v15  ;;  %v35_v18 = vmul.f32 0.6931472, %v1031_v16  ;;  %p1073_p3 = por %p1072_p2, %p1071_p1 }
  0x12   :  { %968 = vmatprep.mubr.msk.f32.mxu1 %vm1092_vm3, %v1093_v10  ;;  %v37_v20 = vmul.f32 0.6931472, %v1033_v17  ;;  %v1035_v21 = vpop.eup %1034 }
  0x13   :  { %v39_v24 = vmul.f32 0.6931472, %v1035_v21  ;;  %p1074_p4 = pnand %p1073_p3, %p1067_p0 }
  0x14   :  { %v988_v22 = vpack.c.bf16 %v37_v20, %v35_v18 }
  0x15   :  { %969 = vmatmul.mubr.msk.f32.gmra.mrb[6].mxu1 %vm46_vm6, %v25_v19 }
  0x16   :  { %971 = vmatprep.mubr.msk.f32.mxu1 %vm1092_vm3, %v1093_v10  ;;  %989 = vmatpush3.bf16.msra.mxu0 %v988_v22 }
  0x17   :  { %936 = vmatprep.subr.mxu0 %v1093_v10 }
  0x19   :  { %972 = vmatmul.mubr.msk.f32.gmra.mrb[8].mxu1 %vm46_vm6, %v26_v23 }
  0x1a   :  { %937 = vmatpush3.msk.msra.mxu0 %vm62_vm5, %v39_v24 }
  0x1b   :  { %939 = vmatmul.mubr.msk.f32.vlgmr.msra.gmra.mrb[0].mxu0 %vm46_vm6, %v22_v13  ;;  %993 = vmatprep.subr.bf16.mxu0 %v1090_v2 }
  0x1c   :  { %941 = vmatprep.mubr.msk.f32.mxu0 %vm1092_vm3, %v1093_v10 }
  0x1f   :  { %942 = vmatmul.mubr.msk.f32.gmra.mrb[2].mxu0 %vm46_vm6, %v23_v14 }
  0x20   :  { %944 = vmatprep.mubr.msk.f32.mxu0 %vm1092_vm3, %v1093_v10 }
  0x23   :  { %945 = vmatmul.mubr.msk.f32.gmra.mrb[4].mxu0 %vm46_vm6, %v24_v15 }
  0x24   :  { %947 = vmatprep.mubr.msk.f32.mxu0 %vm1092_vm3, %v1093_v10 }
  0x27   :  { %948 = vmatmul.mubr.msk.f32.gmra.mrb[6].mxu0 %vm46_vm6, %v25_v19 }
  0x28   :  { %950 = vmatprep.mubr.msk.f32.mxu0 %vm1092_vm3, %v1093_v10 }
  0x2b   :  { %951 = vmatmul.mubr.msk.f32.gmra.mrb[8].mxu0 %vm46_vm6, %v26_v23 }
  0x2c   :  { %984 = vmatprep.mubr.msk.f32.mxu0 %vm1092_vm3, %v1093_v10 }
  0xdc   :  { %v1190_v25 = vpop.f32.mrb[0].mxu1 }
  0xdd   :  { %v259_v26 = vand.u32 2147483647, %v1190_v25  ;;  %v262_v27 = vand.u32 2139095040, %v1190_v25  ;;  %v961_v28 = vpop.f32.mrb[1].mxu1 }
  0xdf   :  { %v263_v29 = vshrl.u32 %v262_v27, 23  ;;  %v266_v30 = vand.u32 8388607, %v259_v26 }
  0xe0   :  { %v1196_v31 = vpop.f32.mrb[2].mxu1 }
  0xe1   :  { %v889_v32 = vadd.s32 4294967169, %v263_v29  ;;  %v362_v33 = vand.u32 2147483647, %v1196_v31  ;;  %v964_v34 = vpop.f32.mrb[3].mxu1  ;;  %v365_v35 = vand.u32 2139095040, %v1196_v31  ;;  %v267_v37 = vor.u32 8388608, %v266_v30 }
  0xe3   :  { %v269_v36 = vadd.s32 1, %v889_v32  ;;  %v366_v38 = vshrl.u32 %v365_v35, 23  ;;  %v1202_v39 = vand.u32 8388607, %v362_v33  ;;  %v1207_v47 = vshll.u32 %v267_v37, 8 }
  0xe4   :  { %v1204_v40 = vpop.f32.mrb[4].mxu1 }
  0xe5   :  { %vm270_vm7 = vcmp.gt.s32.totalorder %v269_v36, 0  ;;  %v967_v41 = vpop.f32.mrb[5].mxu1  ;;  %v893_v43 = vadd.s32 4294967169, %v366_v38  ;;  %v468_v44 = vand.u32 2139095040, %v1204_v40  ;;  %v370_v48 = vor.u32 8388608, %v1202_v39 }
  0xe6   :  { %v271_v42 = vsel %vm270_vm7, %v269_v36, 0  ;;  %v465_v37 = vand.u32 2147483647, %v1204_v40 }
  0xe7   :  { %v272_v45 = vshrl.u32 %v271_v42, 5  ;;  %v273_v46 = vand.u32 31, %v271_v42  ;;  %v372_v49 = vadd.s32 1, %v893_v43  ;;  %v469_v56 = vshrl.u32 %v468_v44, 23 }
  0xe8   :  { %v1210_v50 = vpop.f32.mrb[6].mxu1 }
  0xe9   :  { %v274_v51 = vsub.s32 32, %v273_v46  ;;  %v276_v53 = vshll.u32 %v1094_v52, %v273_v46  ;;  %v279_v55 = vshll.u32 %v1095_v54, %v273_v46  ;;  %v970_v57 = vpop.f32.mrb[7].mxu1  ;;  %v282_v59 = vshll.u32 %v1096_v58, %v273_v46 }
  0xea   :  { %v285_v61 = vshll.u32 %v1097_v60, %v273_v46  ;;  %v288_v63 = vshll.u32 %v1098_v62, %v273_v46  ;;  %vm291_vm8 = vcmp.lt.s32.totalorder %v272_v45, 1  ;;  %vm292_vm9 = vcmp.lt.s32.totalorder %v272_v45, 2 }
  0xeb   :  { %v277_v0 = vshrl.u32 %v1095_v54, %v274_v51  ;;  %v280_v1 = vshrl.u32 %v1096_v58, %v274_v51  ;;  %v283_v3 = vshrl.u32 %v1097_v60, %v274_v51  ;;  %v275_v4 = vshrl.u32 %v1094_v52, %v274_v51 }
  0xec   :  { %v286_v5 = vshrl.u32 %v1098_v62, %v274_v51  ;;  %v289_v7 = vshrl.u32 %v1099_v6, %v274_v51  ;;  %vm293_vm10 = vcmp.lt.s32.totalorder %v272_v45, 3  ;;  %v1223_v8 = vpop.f32.mrb[8].mxu1  ;;  %vm373_vm11 = vcmp.gt.s32.totalorder %v372_v49, 0 }
  0xed   :  { %v278_v9 = vor.u32 %v277_v0, %v276_v53  ;;  %v281_v11 = vor.u32 %v280_v1, %v279_v55  ;;  %v284_v12 = vor.u32 %v283_v3, %v282_v59  ;;  %v973_v13 = vpop.f32.mrb[9].mxu1  ;;  %vm294_vm12 = vcmp.lt.s32.totalorder %v272_v45, 4 }
  0xee   :  { %v287_v14 = vor.u32 %v286_v5, %v285_v61  ;;  %v290_v15 = vor.u32 %v289_v7, %v288_v63  ;;  %v374_v16 = vsel %vm373_vm11, %v372_v49, 0  ;;  %v1225_v17 = vpop.f32.mrb[0].mxu0  ;;  %v1251_v51 = vshll.u32 %v370_v48, 8 }
  0xef   :  { %v295_v18 = vsel %vm291_vm8, %v275_v4, %v278_v9  ;;  %v296_v19 = vsel %vm294_vm12, %v284_v12, 2102212464  ;;  %v299_v20 = vsel %vm291_vm8, %v278_v9, %v281_v11  ;;  %v303_v21 = vsel %vm291_vm8, %v281_v11, %v284_v12  ;;  %v940_v22 = vpop.f32.mrb[1].mxu0 }
  0xf0   :  { %v297_v23 = vsel %vm293_vm10, %v281_v11, %v296_v19  ;;  %v300_v24 = vsel %vm294_vm12, %v287_v14, 920167782  ;;  %v304_v27 = vsel %vm294_vm12, %v290_v15, 1326507024  ;;  %v1231_v28 = vshrl.u32 %v374_v16, 5 }
  0xf1   :  { %v298_v29 = vsel %vm292_vm9, %v295_v18, %v297_v23  ;;  %v301_v30 = vsel %vm293_vm10, %v284_v12, %v300_v24  ;;  %v305_v32 = vsel %vm293_vm10, %v287_v14, %v304_v27  ;;  %v376_v34 = vand.u32 31, %v374_v16 }
  0xf2   :  { %v302_v35 = vsel %vm292_vm9, %v299_v20, %v301_v30  ;;  %v306_v36 = vsel %vm292_vm9, %v303_v21, %v305_v32  ;;  %v1239_v38 = vpop.f32.mrb[2].mxu0  ;;  %v314_v46 = vmul.u32 %v1207_v47, %v298_v29  ;;  %v897_v45 = vadd.s32 4294967169, %v469_v56 }
  0xf3   :  { %v1242_v39 = vmul.u32.u64.low %v1207_v47, %v306_v36  ;;  %v1243_v41 = vmul.u32.u64.high %v1207_v47, %v306_v36, %v1242_v39  ;;  %v1246_v42 = vmul.u32.u64.low %v1207_v47, %v302_v35  ;;  %v1247_v43 = vmul.u32.u64.high %v1207_v47, %v302_v35, %v1246_v42  ;;  %v943_v44 = vpop.f32.mrb[3].mxu0 }
  0xf4   :  { %v377_v49 = vsub.s32 32, %v376_v34  ;;  %v379_v53 = vshll.u32 %v1094_v52, %v376_v34  ;;  %v382_v55 = vshll.u32 %v1095_v54, %v376_v34  ;;  %v385_v57 = vshll.u32 %v1096_v58, %v376_v34 }
  0xf5   :  { %vm394_vm13 = vcmp.lt.s32.totalorder %v1231_v28, 1  ;;  %v388_v47 = vshll.u32 %v1097_v60, %v376_v34  ;;  %vm316_vm14 = vc.u32 %v1243_v41, %v1246_v42  ;;  %v317_v48 = vadd.s32 1, %v1247_v43 }
  0xf6   :  { %v380_v59 = vshrl.u32 %v1095_v54, %v377_v49  ;;  %v383_v61 = vshrl.u32 %v1096_v58, %v377_v49  ;;  %v386_v63 = vshrl.u32 %v1097_v60, %v377_v49  ;;  %v1261_v0 = vpop.f32.mrb[4].mxu0  ;;  %v389_v56 = vshrl.u32 %v1098_v62, %v377_v49 }
  0xf7   :  { %v391_v1 = vshll.u32 %v1098_v62, %v376_v34  ;;  %v946_v3 = vpop.f32.mrb[5].mxu0  ;;  %v392_v9 = vshrl.u32 %v1099_v6, %v377_v49  ;;  %v318_v11 = vsel %vm316_vm14, %v317_v48, %v1247_v43  ;;  %vm395_vm15 = vcmp.lt.s32.totalorder %v1231_v28, 2 }
  0xf8   :  { %v381_v4 = vor.u32 %v380_v59, %v379_v53  ;;  %v384_v5 = vor.u32 %v383_v61, %v382_v55  ;;  %v387_v7 = vor.u32 %v386_v63, %v385_v57  ;;  %v390_v12 = vor.u32 %v389_v56, %v388_v47 }
  0xf9   :  { %vm397_vm0 = vcmp.lt.s32.totalorder %v1231_v28, 4  ;;  %v319_v13 = vadd.s32 %v318_v11, %v314_v46  ;;  %v378_v14 = vshrl.u32 %v1094_v52, %v377_v49  ;;  %v393_v15 = vor.u32 %v392_v9, %v391_v1 }
  0xfa   :  { %v399_v16 = vsel %vm397_vm0, %v387_v7, 2102212464  ;;  %v1273_v18 = vpop.f32.mrb[6].mxu0  ;;  %vm396_vm1 = vcmp.lt.s32.totalorder %v1231_v28, 3  ;;  %v402_v19 = vsel %vm394_vm13, %v381_v4, %v384_v5  ;;  %v403_v20 = vsel %vm397_vm0, %v390_v12, 920167782 }
  0xfb   :  { %v406_v21 = vsel %vm394_vm13, %v384_v5, %v387_v7  ;;  %v949_v22 = vpop.f32.mrb[7].mxu0  ;;  %v320_v23 = vadd.s32 536870912, %v319_v13  ;;  %v398_v24 = vsel %vm394_vm13, %v378_v14, %v381_v4  ;;  %v404_v27 = vsel %vm396_vm1, %v387_v7, %v403_v20 }
  0xfc   :  { %v407_v29 = vsel %vm397_vm0, %v393_v15, 1326507024  ;;  %v400_v30 = vsel %vm396_vm1, %v384_v5, %v399_v16  ;;  %v405_v32 = vsel %vm395_vm15, %v402_v19, %v404_v27  ;;  %v475_v35 = vadd.s32 1, %v897_v45 }
  0xfd   :  { %v408_v34 = vsel %vm396_vm1, %v390_v12, %v407_v29  ;;  %v1284_v36 = vshrl.u32 %v320_v23, 30  ;;  %v1289_v43 = vmul.u32.u64.low %v1251_v51, %v405_v32  ;;  %v1290_v44 = vmul.u32.u64.high %v1251_v51, %v405_v32, %v1289_v43 }
  0xfe   :  { %v409_v39 = vsel %vm395_vm15, %v406_v21, %v408_v34  ;;  %v1293_v46 = vpop.f32.mrb[8].mxu0  ;;  %vm476_vm2 = vcmp.gt.s32.totalorder %v475_v35, 0  ;;  %v401_v57 = vsel %vm395_vm15, %v398_v24, %v400_v30  ;;  %v472_v61 = vand.u32 8388607, %v465_v37 }
  0xff   :  { %v1296_v49 = vmul.u32.u64.low %v1251_v51, %v409_v39  ;;  %v1297_v53 = vmul.u32.u64.high %v1251_v51, %v409_v39, %v1296_v49  ;;  %v952_v55 = vpop.f32.mrb[9].mxu0  ;;  %v322_v45 = vshll.u32 %v1284_v36, 30  ;;  %v477_v59 = vsel %vm476_vm2, %v475_v35, 0 }
 0x100   :  { %v479_v63 = vand.u32 31, %v477_v59  ;;  %v420_v48 = vadd.s32 1, %v1290_v44  ;;  %v417_v56 = vmul.u32 %v1251_v51, %v401_v57  ;;  %v473_v28 = vor.u32 8388608, %v472_v61 }
 0x101   :  { %v323_v47 = vsub.s32 %v319_v13, %v322_v45  ;;  %vm419_vm3 = vc.u32 %v1297_v53, %v1289_v43  ;;  %v315_v9 = vadd.s32 %v1246_v42, %v1243_v41  ;;  %v478_v19 = vshrl.u32 %v477_v59, 5 }
 0x102   :  { %v480_v1 = vsub.s32 32, %v479_v63  ;;  %v421_v4 = vsel %vm419_vm3, %v420_v48, %v1290_v44  ;;  %v488_v20 = vshll.u32 %v1096_v58, %v479_v63  ;;  %v1318_v21 = vshll.u32 %v473_v28, 8 }
 0x103   :  { %v325_v3 = vsub.s32 0, %v323_v47  ;;  %v422_v5 = vadd.s32 %v421_v4, %v417_v56  ;;  %v482_v41 = vshll.u32 %v1094_v52, %v479_v63  ;;  %v485_v42 = vshll.u32 %v1095_v54, %v479_v63 }
 0x104   :  { %v483_v12 = vshrl.u32 %v1095_v54, %v480_v1  ;;  %v486_v14 = vshrl.u32 %v1096_v58, %v480_v1  ;;  %v489_v51 = vshrl.u32 %v1097_v60, %v480_v1  ;;  %v492_v15 = vshrl.u32 %v1098_v62, %v480_v1 }
 0x105   :  { %v890_v7 = vmin.u32 %v325_v3, %v323_v47  ;;  %v423_v11 = vadd.s32 536870912, %v422_v5  ;;  %v491_v23 = vshll.u32 %v1097_v60, %v479_v63  ;;  %v495_v29 = vshrl.u32 %v1099_v6, %v480_v1 }
 0x106   :  { %v490_v27 = vor.u32 %v489_v51, %v488_v20  ;;  %v571_v30 = vand.u32 2139095040, %v1210_v50  ;;  %v484_v32 = vor.u32 %v483_v12, %v482_v41  ;;  %v487_v34 = vor.u32 %v486_v14, %v485_v42 }
 0x107   :  { %v327_v13 = vclz %v890_v7  ;;  %v1315_v16 = vshrl.u32 %v423_v11, 30  ;;  %v493_v35 = vor.u32 %v492_v15, %v491_v23  ;;  %v481_v49 = vshrl.u32 %v1094_v52, %v480_v1 }
 0x108   :  { %v494_v55 = vshll.u32 %v1098_v62, %v479_v63  ;;  %vm497_vm5 = vcmp.lt.s32.totalorder %v478_v19, 1  ;;  %vm500_vm6 = vcmp.lt.s32.totalorder %v478_v19, 4  ;;  %vm498_vm7 = vcmp.lt.s32.totalorder %v478_v19, 2 }
 0x109   :  { %v891_v22 = vadd.s32 4294967294, %v327_v13  ;;  %v425_v24 = vshll.u32 %v1315_v16, 30  ;;  %v502_v56 = vsel %vm500_vm6, %v490_v27, 2102212464  ;;  %v505_v28 = vsel %vm497_vm5, %v484_v32, %v487_v34 }
 0x10a   :  { %v496_v48 = vor.u32 %v495_v29, %v494_v55  ;;  %vm499_vm8 = vcmp.lt.s32.totalorder %v478_v19, 3  ;;  %v501_v63 = vsel %vm497_vm5, %v481_v49, %v484_v32  ;;  %v509_v12 = vsel %vm497_vm5, %v487_v34, %v490_v27 }
 0x10b   :  { %vm892_vm4 = vcmp.lt.s32.totalorder %v891_v22, 0  ;;  %v1326_v44 = vsub.s32 %v422_v5, %v425_v24  ;;  %v506_v5 = vsel %vm500_vm6, %v493_v35, 920167782  ;;  %vm261_vm9 = vcmp.lt.s32.totalorder %v1190_v25, 0 }
 0x10c   :  { %v330_v39 = vsel %vm892_vm4, 0, %v891_v22  ;;  %v510_v51 = vsel %vm500_vm6, %v496_v48, 1326507024  ;;  %v572_v41 = vshrl.u32 %v571_v30, 23  ;;  %v345_v49 = vsub.s32 4, %v1284_v36 }
 0x10d   :  { %v331_v45 = vsub.s32 32, %v330_v39  ;;  %v335_v57 = vsub.s32 4294967266, %v330_v39  ;;  %v332_v59 = vshll.u32 %v323_v47, %v330_v39  ;;  %v428_v61 = vsub.s32 0, %v1326_v44 }
 0x10e   :  { %v507_v47 = vsel %vm499_vm8, %v490_v27, %v506_v5  ;;  %v511_v22 = vsel %vm499_vm8, %v493_v35, %v510_v51  ;;  %v901_v39 = vadd.s32 4294967169, %v572_v41  ;;  %v568_v30 = vand.u32 2147483647, %v1210_v50 }
 0x10f   :  { %v333_v3 = vshrl.u32 %v315_v9, %v331_v45  ;;  %v336_v4 = vadd.s32 127, %v335_v57  ;;  %v894_v1 = vmin.u32 %v428_v61, %v1326_v44  ;;  %v503_v9 = vsel %vm499_vm8, %v487_v34, %v502_v56 }
 0x110   :  { %v508_v14 = vsel %vm498_vm7, %v505_v28, %v507_v47  ;;  %v512_v23 = vsel %vm498_vm7, %v509_v12, %v511_v22  ;;  %v504_v35 = vsel %vm498_vm7, %v501_v63, %v503_v9  ;;  %v418_v45 = vadd.s32 %v1289_v43, %v1297_v53 }
 0x111   :  { %v334_v7 = vor.u32 %v333_v3, %v332_v59  ;;  %v337_v11 = vshll.u32 %v336_v4, 23  ;;  %v430_v13 = vclz %v894_v1  ;;  %v578_v59 = vadd.s32 1, %v901_v39 }
 0x112   :  { %v1342_v24 = vmul.u32.u64.low %v1318_v21, %v508_v14  ;;  %v1343_v29 = vmul.u32.u64.high %v1318_v21, %v508_v14, %v1342_v24  ;;  %v1347_v32 = vmul.u32.u64.low %v1318_v21, %v512_v23  ;;  %v1348_v34 = vmul.u32.u64.high %v1318_v21, %v512_v23, %v1347_v32 }
 0x113   :  { %v338_v15 = vor.u32 4788187, %v337_v11  ;;  %v341_v20 = vcvt.s32.f32 %v334_v7  ;;  %v895_v42 = vadd.s32 4294967294, %v430_v13  ;;  %v448_v56 = vsub.s32 4, %v1315_v16 }
 0x114   :  { %v523_v3 = vadd.s32 1, %v1343_v29  ;;  %v520_v19 = vmul.u32 %v1318_v21, %v504_v35  ;;  %vm522_vm11 = vc.u32 %v1348_v34, %v1342_v24  ;;  %vm579_vm12 = vcmp.gt.s32.totalorder %v578_v59, 0 }
 0x115   :  { %v339_v27 = vand.u32 2147483647, %v338_v15  ;;  %vm896_vm10 = vcmp.lt.s32.totalorder %v895_v42, 0  ;;  %vm364_vm13 = vcmp.lt.s32.totalorder %v1196_v31, 0  ;;  %v580_v7 = vsel %vm579_vm12, %v578_v59, 0 }
 0x116   :  { %v433_v57 = vsel %vm896_vm10, 0, %v895_v42  ;;  %v524_v43 = vsel %vm522_vm11, %v523_v3, %v1343_v29  ;;  %v575_v47 = vand.u32 8388607, %v568_v30  ;;  %vm1372_vm14 = vcmp.le.f32.partialorder %v259_v26, 0.7853982 }
 0x117   :  { %v342_v55 = vmul.f32 %v341_v20, %v339_v27  ;;  %v434_v61 = vsub.s32 32, %v433_v57  ;;  %v438_v48 = vsub.s32 4294967266, %v433_v57  ;;  %v435_v28 = vshll.u32 %v1326_v44, %v433_v57 }
 0x118   :  { %v525_v63 = vadd.s32 %v524_v43, %v520_v19  ;;  %v346_v44 = vsel %vm261_vm9, %v345_v49, %v1284_v36  ;;  %v449_v13 = vsel %vm364_vm13, %v448_v56, %v1315_v16  ;;  %v582_v14 = vand.u32 31, %v580_v7 }
 0x119   :  { %v343_v4 = vxor.u32 2147483648, %v342_v55  ;;  %v436_v5 = vshrl.u32 %v418_v45, %v434_v61  ;;  %v439_v1 = vadd.s32 127, %v438_v48  ;;  %v348_v15 = vsel %vm1372_vm14, 0, %v346_v44 }
 0x11a   :  { %v526_v9 = vadd.s32 536870912, %v525_v63  ;;  %vm1386_vm15 = vcmp.le.f32.partialorder %v362_v33, 0.7853982  ;;  %v583_v22 = vsub.s32 32, %v582_v14  ;;  %v576_v23 = vor.u32 8388608, %v575_v47 }
 0x11b   :  { %v344_v53 = vsel %vm261_vm9, %v343_v4, %v342_v55  ;;  %v437_v21 = vor.u32 %v436_v5, %v435_v28  ;;  %v440_v11 = vshll.u32 %v439_v1, 23  ;;  %v451_v42 = vsel %vm1386_vm15, 0, %v449_v13 }
 0x11c   :  { %v347_v36 = vsel %vm1372_vm14, %v1190_v25, %v344_v53  ;;  %v1390_v20 = vshrl.u32 %v526_v9, 30  ;;  %v1395_v27 = vshrl.u32 %v580_v7, 5  ;;  %v586_v32 = vshrl.u32 %v1095_v54, %v583_v22 }
 0x11d   :  { %v441_v51 = vor.u32 4788187, %v440_v11  ;;  %v444_v41 = vcvt.s32.f32 %v437_v21  ;;  %1036 = vcosq.f32 %v347_v36  ;;  %v589_v39 = vshrl.u32 %v1096_v58, %v583_v22 }
 0x11e   :  { %v528_v29 = vshll.u32 %v1390_v20, 30  ;;  %v592_v49 = vshrl.u32 %v1097_v60, %v583_v22  ;;  %v595_v35 = vshrl.u32 %v1098_v62, %v583_v22  ;;  %1038 = vsinq.f32 %v347_v36 }
 0x11f   :  { %v442_v16 = vand.u32 2147483647, %v441_v51  ;;  %v585_v45 = vshll.u32 %v1094_v52, %v582_v14  ;;  %v588_v57 = vshll.u32 %v1095_v54, %v582_v14  ;;  %v591_v61 = vshll.u32 %v1096_v58, %v582_v14 }
 0x120   :  { %v1401_v55 = vsub.s32 %v525_v63, %v528_v29  ;;  %v594_v48 = vshll.u32 %v1097_v60, %v582_v14  ;;  %v598_v56 = vshrl.u32 %v1099_v6, %v583_v22  ;;  %v597_v28 = vshll.u32 %v1098_v62, %v582_v14 }
 0x121   :  { %v445_v33 = vmul.f32 %v444_v41, %v442_v16  ;;  %v587_v4 = vor.u32 %v586_v32, %v585_v45  ;;  %v590_v5 = vor.u32 %v589_v39, %v588_v57  ;;  %v593_v1 = vor.u32 %v592_v49, %v591_v61 }
 0x122   :  { %v531_v3 = vsub.s32 0, %v1401_v55  ;;  %v596_v43 = vor.u32 %v595_v35, %v594_v48  ;;  %v1412_v53 = vand.u32 3, %v348_v15  ;;  %v1414_v63 = vand.u32 3, %v451_v42 }
 0x123   :  { %v446_v59 = vxor.u32 2147483648, %v445_v33  ;;  %v521_v7 = vadd.s32 %v1342_v24, %v1348_v34  ;;  %v599_v11 = vor.u32 %v598_v56, %v597_v28  ;;  %vm600_vm0 = vcmp.lt.s32.totalorder %v1395_v27, 1 }
 0x124   :  { %v898_v44 = vmin.u32 %v531_v3, %v1401_v55  ;;  %v616_v47 = vshll.u32 %v576_v23, 8  ;;  %v551_v13 = vsub.s32 4, %v1390_v20  ;;  %v584_v9 = vshrl.u32 %v1094_v52, %v583_v22 }
 0x125   :  { %v447_v19 = vsel %vm364_vm13, %v446_v59, %v445_v33  ;;  %vm603_vm1 = vcmp.lt.s32.totalorder %v1395_v27, 4  ;;  %vm467_vm2 = vcmp.lt.s32.totalorder %v1204_v40, 0  ;;  %vm602_vm3 = vcmp.lt.s32.totalorder %v1395_v27, 3 }
 0x126   :  { %v450_v21 = vsel %vm1386_vm15, %v1196_v31, %v447_v19  ;;  %v533_v12 = vclz %v898_v44  ;;  %v605_v24 = vsel %vm603_vm1, %v593_v1, 2102212464  ;;  %v608_v34 = vsel %vm600_vm0, %v587_v4, %v590_v5 }
 0x127   :  { %v609_v14 = vsel %vm603_vm1, %v596_v43, 920167782  ;;  %v1037_v36 = vpop.eup %1036  ;;  %1040 = vcosq.f32 %v450_v21  ;;  %vm601_vm4 = vcmp.lt.s32.totalorder %v1395_v27, 2  ;;  %v612_v22 = vsel %vm600_vm0, %v590_v5, %v593_v1 }
 0x128   :  { %v899_v51 = vadd.s32 4294967294, %v533_v12  ;;  %v610_v15 = vsel %vm602_vm3, %v593_v1, %v609_v14  ;;  %1042 = vsinq.f32 %v450_v21  ;;  %v613_v16 = vsel %vm603_vm1, %v599_v11, 1326507024  ;;  %v1039_v41 = vpop.eup %1038 }
 0x129   :  { %v611_v26 = vsel %vm601_vm4, %v608_v34, %v610_v15  ;;  %vm1439_vm5 = vcmp.le.f32.partialorder %v465_v37, 0.7853982  ;;  %v604_v23 = vsel %vm600_vm0, %v584_v9, %v587_v4  ;;  %v606_v29 = vsel %vm602_vm3, %v590_v5, %v605_v24 }
 0x12a   :  { %vm900_vm6 = vcmp.lt.s32.totalorder %v899_v51, 0  ;;  %v614_v32 = vsel %vm602_vm3, %v596_v43, %v613_v16  ;;  %v1451_v49 = vmul.u32.u64.low %v616_v47, %v611_v26  ;;  %v1452_v35 = vmul.u32.u64.high %v616_v47, %v611_v26, %v1451_v49 }
 0x12b   :  { %v536_v33 = vsel %vm900_vm6, 0, %v899_v51  ;;  %v615_v39 = vsel %vm601_vm4, %v612_v22, %v614_v32  ;;  %v358_v37 = vxor.u32 2147483648, %v1037_v36  ;;  %v674_v59 = vand.u32 2139095040, %v1223_v8 }
 0x12c   :  { %v537_v45 = vsub.s32 32, %v536_v33  ;;  %v541_v57 = vsub.s32 4294967266, %v536_v33  ;;  %v355_v61 = vxor.u32 2147483648, %v1039_v41  ;;  %v607_v48 = vsel %vm601_vm4, %v604_v23, %v606_v29 }
 0x12d   :  { %v1457_v56 = vmul.u32.u64.low %v616_v47, %v615_v39  ;;  %v1458_v3 = vmul.u32.u64.high %v616_v47, %v615_v39, %v1457_v56  ;;  %v538_v4 = vshll.u32 %v1401_v55, %v536_v33  ;;  %v675_v5 = vshrl.u32 %v674_v59, 23 }
 0x12e   :  { %v539_v28 = vshrl.u32 %v521_v7, %v537_v45  ;;  %v542_v19 = vadd.s32 127, %v541_v57  ;;  %vm351_vm7 = vweird.f32 %v1190_v25  ;;  %vm353_vm8 = vcmp.lt.s32.totalorder %v1412_v53, 2 }
 0x12f   :  { %vm354_vm9 = vcmp.eq.s32.totalorder %v1412_v53, 0  ;;  %v626_v1 = vadd.s32 1, %v1452_v35  ;;  %v671_v43 = vand.u32 2147483647, %v1223_v8  ;;  %v552_v21 = vsel %vm467_vm2, %v551_v13, %v1390_v20 }
 0x130   :  { %v540_v27 = vor.u32 %v539_v28, %v538_v4  ;;  %v543_v44 = vshll.u32 %v542_v19, 23  ;;  %v905_v55 = vadd.s32 4294967169, %v675_v5  ;;  %vm357_vm10 = vcmp.eq.s32.totalorder %v1412_v53, 2 }
 0x131   :  { %vm457_vm11 = vcmp.eq.s32.totalorder %v1414_v63, 0  ;;  %v623_v7 = vmul.u32 %v616_v47, %v607_v48  ;;  %vm625_vm12 = vc.u32 %v1458_v3, %v1451_v49  ;;  %v1041_v11 = vpop.eup %1040  ;;  %v356_v12 = vsel %vm354_vm9, %v1037_v36, %v355_v61 }
 0x132   :  { %v359_v9 = vsel %vm357_vm10, %v358_v37, %v1039_v41  ;;  %v544_v24 = vor.u32 4788187, %v543_v44  ;;  %v627_v34 = vsel %vm625_vm12, %v626_v1, %v1452_v35  ;;  %v1043_v14 = vpop.eup %1042  ;;  %v554_v51 = vsel %vm1439_vm5, 0, %v552_v21 }
 0x133   :  { %v628_v15 = vadd.s32 %v627_v34, %v623_v7  ;;  %v681_v20 = vadd.s32 1, %v905_v55  ;;  %v249_v13 = vmul.f32 1.442695, %v1225_v17  ;;  %vm460_vm13 = vcmp.eq.s32.totalorder %v1414_v63, 2 }
 0x134   :  { %v545_v26 = vand.u32 2147483647, %v544_v24  ;;  %v547_v47 = vcvt.s32.f32 %v540_v27  ;;  %v678_v22 = vand.u32 8388607, %v671_v43  ;;  %v360_v36 = vsel %vm353_vm8, %v356_v12, %v359_v9 }
 0x135   :  { %v461_v16 = vxor.u32 2147483648, %v1041_v11  ;;  %v629_v41 = vadd.s32 536870912, %v628_v15  ;;  %vm682_vm14 = vcmp.gt.s32.totalorder %v681_v20, 0  ;;  %vm456_vm15 = vcmp.lt.s32.totalorder %v1414_v63, 2 }
 0x136   :  { %v458_v23 = vxor.u32 2147483648, %v1043_v14  ;;  %v548_v29 = vmul.f32 %v547_v47, %v545_v26  ;;  %v1482_v32 = vand.u32 3, %v554_v51  ;;  %v683_v17 = vsel %vm682_vm14, %v681_v20, 0 }
 0x137   :  { %v1484_v33 = vshrl.u32 %v629_v41, 30  ;;  %v685_v39 = vand.u32 31, %v683_v17  ;;  %1044 = vpow2.f32 %v249_v13  ;;  %v251_v35 = vmul.f32 1.442695, %v1239_v38 }
 0x138   :  { %v361_v53 = vsel %vm351_vm7, nan, %v360_v36  ;;  %v549_v37 = vxor.u32 2147483648, %v548_v29  ;;  %v679_v45 = vor.u32 8388608, %v678_v22  ;;  %v253_v57 = vmul.f32 1.442695, %v1261_v0 }
 0x139   :  { %v462_v59 = vsel %vm460_vm13, %v461_v16, %v1043_v14  ;;  %v1493_v61 = vadd.s32 %v1451_v49, %v1458_v3  ;;  %v631_v48 = vshll.u32 %v1484_v33, 30  ;;  %v686_v56 = vsub.s32 32, %v685_v39 }
 0x13a   :  { %v459_v4 = vsel %vm457_vm11, %v1041_v11, %v458_v23  ;;  %v550_v25 = vsel %vm467_vm2, %v549_v37, %v548_v29  ;;  %v688_v38 = vshll.u32 %v1094_v52, %v685_v39  ;;  %v691_v28 = vshll.u32 %v1095_v54, %v685_v39 }
 0x13b   :  { %v553_v0 = vsel %vm1439_vm5, %v1204_v40, %v550_v25  ;;  %v1505_v19 = vsub.s32 %v628_v15, %v631_v48  ;;  %v694_v49 = vshll.u32 %v1096_v58, %v685_v39  ;;  %1046 = vpow2.f32 %v251_v35 }
 0x13c   :  { %vm454_vm0 = vweird.f32 %v1196_v31  ;;  %1048 = vcosq.f32 %v553_v0  ;;  %v689_v3 = vshrl.u32 %v1095_v54, %v686_v56  ;;  %v692_v5 = vshrl.u32 %v1096_v58, %v686_v56 }
 0x13d   :  { %v697_v1 = vshll.u32 %v1097_v60, %v685_v39  ;;  %1050 = vsinq.f32 %v553_v0  ;;  %v634_v27 = vsub.s32 0, %v1505_v19  ;;  %v684_v44 = vshrl.u32 %v683_v17, 5 }
 0x13e   :  { %v695_v42 = vshrl.u32 %v1097_v60, %v686_v56  ;;  %v690_v21 = vor.u32 %v689_v3, %v688_v38  ;;  %v693_v55 = vor.u32 %v692_v5, %v691_v28  ;;  %v698_v7 = vshrl.u32 %v1098_v62, %v686_v56 }
 0x13f   :  { %v700_v11 = vshll.u32 %v1098_v62, %v685_v39  ;;  %v463_v12 = vsel %vm456_vm15, %v459_v4, %v462_v59  ;;  %v902_v54 = vmin.u32 %v634_v27, %v1505_v19  ;;  %v687_v58 = vshrl.u32 %v1094_v52, %v686_v56 }
 0x140   :  { %v1520_v9 = vshll.u32 %v679_v45, 8  ;;  %vm563_vm1 = vcmp.eq.s32.totalorder %v1482_v32, 2  ;;  %v696_v24 = vor.u32 %v695_v42, %v694_v49  ;;  %v699_v34 = vor.u32 %v698_v7, %v697_v1 }
 0x141   :  { %v701_v60 = vshrl.u32 %v1099_v6, %v686_v56  ;;  %1052 = vpow2.f32 %v253_v57  ;;  %v1045_v14 = vpop.eup %1044  ;;  %vm560_vm2 = vcmp.eq.s32.totalorder %v1482_v32, 0  ;;  %v636_v62 = vclz %v902_v54 }
 0x142   :  { %vm703_vm3 = vcmp.lt.s32.totalorder %v684_v44, 1  ;;  %vm704_vm4 = vcmp.lt.s32.totalorder %v684_v44, 2  ;;  %vm706_vm5 = vcmp.lt.s32.totalorder %v684_v44, 4  ;;  %vm559_vm6 = vcmp.lt.s32.totalorder %v1482_v32, 2 }
 0x143   :  { %v702_v63 = vor.u32 %v701_v60, %v700_v11  ;;  %vm705_vm7 = vcmp.lt.s32.totalorder %v684_v44, 3  ;;  %v708_v52 = vsel %vm706_vm5, %v696_v24, 2102212464  ;;  %v711_v51 = vsel %vm703_vm3, %v690_v21, %v693_v55 }
 0x144   :  { %v903_v15 = vadd.s32 4294967294, %v636_v62  ;;  %v707_v20 = vsel %vm703_vm3, %v687_v58, %v690_v21  ;;  %v712_v13 = vsel %vm706_vm5, %v699_v34, 920167782  ;;  %v715_v26 = vsel %vm703_vm3, %v693_v55, %v696_v24 }
 0x145   :  { %v709_v47 = vsel %vm705_vm7, %v693_v55, %v708_v52  ;;  %v713_v6 = vsel %vm705_vm7, %v696_v24, %v712_v13  ;;  %v716_v22 = vsel %vm706_vm5, %v702_v63, 1326507024  ;;  %v774_v36 = vmul.f32 %v1045_v14, %v361_v53  ;;  %v1047_v16 = vpop.eup %1046 }
 0x146   :  { %v464_v41 = vsel %vm454_vm0, nan, %v463_v12  ;;  %vm904_vm8 = vcmp.lt.s32.totalorder %v903_v15, 0  ;;  %v714_v23 = vsel %vm704_vm4, %v711_v51, %v713_v6  ;;  %v717_v29 = vsel %vm705_vm7, %v699_v34, %v716_v22  ;;  %v1049_v17 = vpop.eup %1048 }
 0x147   :  { %v639_v39 = vsel %vm904_vm8, 0, %v903_v15  ;;  %v718_v35 = vsel %vm704_vm4, %v715_v26, %v717_v29  ;;  %v1531_v37 = vmul.u32.u64.low %v1520_v9, %v714_v23  ;;  %v1532_v45 = vmul.u32.u64.high %v1520_v9, %v714_v23, %v1531_v37  ;;  %v1051_v57 = vpop.eup %1050 }
 0x148   :  { %v564_v59 = vxor.u32 2147483648, %v1049_v17  ;;  %v640_v53 = vsub.s32 32, %v639_v39  ;;  %v644_v48 = vsub.s32 4294967266, %v639_v39  ;;  %v710_v31 = vsel %vm704_vm4, %v707_v20, %v709_v47 }
 0x149   :  { %v561_v56 = vxor.u32 2147483648, %v1051_v57  ;;  %v1537_v4 = vmul.u32.u64.low %v1520_v9, %v718_v35  ;;  %v1538_v25 = vmul.u32.u64.high %v1520_v9, %v718_v35, %v1537_v4  ;;  %v775_v38 = vmul.f32 %v1047_v16, %v464_v41 }
 0x14a   :  { %v565_v28 = vsel %vm563_vm1, %v564_v59, %v1051_v57  ;;  %v641_v0 = vshll.u32 %v1505_v19, %v639_v39  ;;  %v642_v49 = vshrl.u32 %v1493_v61, %v640_v53  ;;  %v645_v3 = vadd.s32 127, %v644_v48 }
 0x14b   :  { %v1053_v5 = vpop.eup %1052  ;;  %v562_v1 = vsel %vm560_vm2, %v1049_v17, %v561_v56  ;;  %v729_v27 = vadd.s32 1, %v1532_v45  ;;  %v779_v44 = vmax.f32 %v774_v36, 0.0  ;;  %v780_v42 = vmax.f32 %v775_v38, 0.0 }
 0x14c   :  { %vm557_vm9 = vweird.f32 %v1204_v40  ;;  %v566_v21 = vsel %vm559_vm6, %v562_v1, %v565_v28  ;;  %v643_v55 = vor.u32 %v642_v49, %v641_v0  ;;  %v646_v7 = vshll.u32 %v645_v3, 23 }
 0x14d   :  { %v567_v11 = vsel %vm557_vm9, nan, %v566_v21  ;;  %v726_v19 = vmul.u32 %v1520_v9, %v710_v31  ;;  %vm728_vm10 = vc.u32 %v1538_v25, %v1531_v37  ;;  %v994_v61 = vpack.c.bf16 %v780_v42, %v779_v44 }
 0x14e   :  { %v647_v12 = vor.u32 4788187, %v646_v7  ;;  %v730_v54 = vsel %vm728_vm10, %v729_v27, %v1532_v45  ;;  %v776_v58 = vmul.f32 %v1053_v5, %v567_v11  ;;  %v650_v40 = vcvt.s32.f32 %v643_v55 }
 0x14f   :  { %v731_v24 = vadd.s32 %v730_v54, %v726_v19  ;;  %995 = vmatpush3.bf16.msra.mxu0 %v994_v61  ;;  %vm570_vm11 = vcmp.lt.s32.totalorder %v1210_v50, 0  ;;  %vm569_vm12 = vcmp.le.f32.partialorder %v568_v30, 0.7853982  ;;  %v654_v52 = vsub.s32 4, %v1484_v33 }
 0x150   :  { %v648_v34 = vand.u32 2147483647, %v647_v12  ;;  %996 = vmatprep.subr.bf16.mxu0 %v1090_v2  ;;  %v255_v2 = vmul.f32 1.442695, %v1273_v18  ;;  %v727_v29 = vadd.s32 %v1531_v37, %v1538_v25  ;;  %vm660_vm1 = vweird.f32 %v1210_v50 }
 0x151   :  { %v732_v32 = vadd.s32 536870912, %v731_v24  ;;  %v655_v13 = vsel %vm570_vm11, %v654_v52, %v1484_v33  ;;  %v781_v0 = vmax.f32 %v776_v58, 0.0  ;;  %vm673_vm2 = vcmp.lt.s32.totalorder %v1223_v8, 0 }
 0x152   :  { %v651_v60 = vmul.f32 %v650_v40, %v648_v34  ;;  %v657_v47 = vsel %vm569_vm12, 0, %v655_v13  ;;  %vm672_vm3 = vcmp.le.f32.partialorder %v671_v43, 0.7853982  ;;  %v257_v42 = vmul.f32 1.442695, %v1293_v46 }
 0x153   :  { %v1555_v14 = vshrl.u32 %v732_v32, 30  ;;  %v661_v36 = vand.u32 3, %v657_v47  ;;  %vm763_vm7 = vweird.f32 %v1223_v8  ;;  %v27_v40 = vld [vmem:[%s1597_s2] sm:$0x1]  ;;  %vm786_vm8 = vcmask 326656  }
 0x154   :  { %v652_v62 = vxor.u32 2147483648, %v651_v60  ;;  %v785_v32 = vstv %s1598_s3 }
 0x155   :  { %v734_v9 = vshll.u32 %v1555_v14, 30  ;;  %vm663_vm14 = vcmp.eq.s32.totalorder %v661_v36, 0  ;;  %vm666_vm15 = vcmp.eq.s32.totalorder %v661_v36, 2  ;;  %vm662_vm0 = vcmp.lt.s32.totalorder %v661_v36, 2 }
 0x156   :  { %v653_v63 = vsel %vm570_vm11, %v652_v62, %v651_v60  ;;  %v757_v27 = vsub.s32 4, %v1555_v14 }
 0x157   :  { %v656_v51 = vsel %vm569_vm12, %v1210_v50, %v653_v63  ;;  %v735_v15 = vsub.s32 %v731_v24, %v734_v9 }
 0x158   :  { %1054 = vcosq.f32 %v656_v51  ;;  %v758_v21 = vsel %vm673_vm2, %v757_v27, %v1555_v14 }
 0x159   :  { %1056 = vsinq.f32 %v656_v51  ;;  %v737_v20 = vsub.s32 0, %v735_v15  ;;  %v760_v55 = vsel %vm672_vm3, 0, %v758_v21 }
 0x15a   :  { %1058 = vpow2.f32 %v255_v2  ;;  %v764_v7 = vand.u32 3, %v760_v55 }
 0x15b   :  { %v906_v26 = vmin.u32 %v737_v20, %v735_v15 }
 0x15c   :  { %vm769_vm4 = vcmp.eq.s32.totalorder %v764_v7, 2  ;;  %vm766_vm5 = vcmp.eq.s32.totalorder %v764_v7, 0  ;;  %vm765_vm6 = vcmp.lt.s32.totalorder %v764_v7, 2 }
 0x15d   :  { %v739_v6 = vclz %v906_v26 }
 0x15f   :  { %v907_v22 = vadd.s32 4294967294, %v739_v6 }
 0x161   :  { %vm908_vm13 = vcmp.lt.s32.totalorder %v907_v22, 0 }
 0x162   :  { %v1055_v30 = vpop.eup %1054  ;;  %v742_v16 = vsel %vm908_vm13, 0, %v907_v22 }
 0x163   :  { %v1057_v41 = vpop.eup %1056  ;;  %v667_v23 = vxor.u32 2147483648, %v1055_v30  ;;  %v743_v17 = vsub.s32 32, %v742_v16  ;;  %v747_v18 = vsub.s32 4294967266, %v742_v16  ;;  %v744_v35 = vshll.u32 %v735_v15, %v742_v16 }
 0x164   :  { %v664_v39 = vxor.u32 2147483648, %v1057_v41  ;;  %v1059_v59 = vpop.eup %1058 }
 0x165   :  { %v668_v33 = vsel %vm666_vm15, %v667_v23, %v1057_v41  ;;  %v745_v45 = vshrl.u32 %v727_v29, %v743_v17  ;;  %v748_v57 = vadd.s32 127, %v747_v18 }
 0x166   :  { %v665_v53 = vsel %vm663_vm14, %v1055_v30, %v664_v39 }
 0x167   :  { %v669_v48 = vsel %vm662_vm0, %v665_v53, %v668_v33  ;;  %v746_v31 = vor.u32 %v745_v45, %v744_v35  ;;  %v749_v56 = vshll.u32 %v748_v57, 23 }
 0x168   :  { %v670_v4 = vsel %vm660_vm1, nan, %v669_v48 }
 0x169   :  { %v750_v38 = vor.u32 4788187, %v749_v56  ;;  %v777_v37 = vmul.f32 %v1059_v59, %v670_v4  ;;  %v753_v28 = vcvt.s32.f32 %v746_v31 }
 0x16b   :  { %v751_v25 = vand.u32 2147483647, %v750_v38  ;;  %v782_v49 = vmax.f32 %v777_v37, 0.0 }
 0x16d   :  { %v754_v3 = vmul.f32 %v753_v28, %v751_v25  ;;  %v997_v5 = vpack.c.bf16 %v782_v49, %v781_v0 }
 0x16f   :  { %v755_v1 = vxor.u32 2147483648, %v754_v3  ;;  %998 = vmatpush3.bf16.msra.mxu0 %v997_v5 }
 0x170   :  { %982 = vmatprep.subr.mxu0 %v1093_v10 }
 0x171   :  { %v756_v50 = vsel %vm673_vm2, %v755_v1, %v754_v3 }
 0x172   :  { %v759_v44 = vsel %vm672_vm3, %v1223_v8, %v756_v50 }
 0x173   :  { %1060 = vcosq.f32 %v759_v44 }
 0x174   :  { %1062 = vsinq.f32 %v759_v44 }
 0x175   :  { %1064 = vpow2.f32 %v257_v42 }
 0x17d   :  { %v1061_v11 = vpop.eup %1060 }
 0x17e   :  { %v1063_v19 = vpop.eup %1062  ;;  %v770_v10 = vxor.u32 2147483648, %v1061_v11 }
 0x17f   :  { %v767_v61 = vxor.u32 2147483648, %v1063_v19  ;;  %v1065_v12 = vpop.eup %1064 }
 0x180   :  { %v771_v43 = vsel %vm769_vm4, %v770_v10, %v1063_v19 }
 0x181   :  { %v768_v54 = vsel %vm766_vm5, %v1061_v11, %v767_v61 }
 0x182   :  { %v772_v58 = vsel %vm765_vm6, %v768_v54, %v771_v43 }
 0x183   :  { %v773_v46 = vsel %vm763_vm7, nan, %v772_v58 }
 0x184   :  { %v778_v24 = vmul.f32 %v1065_v12, %v773_v46 }
 0x186   :  { %v783_v34 = vmax.f32 %v778_v24, 0.0 }
 0x188   :  { %983 = vmatpush3.msra.mxu0 %v783_v34 }
 0x189   :  { %985 = vmatmul.mubr.msk.f32.vlgmr.msra.gmra.mrb[10].mxu0 %vm786_vm8, %v27_v40 }
 0x25c   :  { %v856_v60 = vpop.f32.mrb[10].mxu0 }
 0x25d   :  { %v857_v14 = vadd.f32 %v856_v60, %v785_v32  ;;  %v986_v8 = vpop.f32.mrb[11].mxu0 }
 0x25f   :  { %860 = vst [vmem:[#allocation3] sm:$0x1] %v857_v14 }
 0x260   :  { %1077 = shalt.err (!%p1074_p4)
}
 0x261   :  { %s1078_s12 = scalar_lea.hbm %s1599_s4, 16 }
 0x262   :  { %p1079_p5 = scmp.ne.s32.totalorder %s1599_s4, %s1078_s12  ;;  %p1082_p6 = scmp.lt.u32.totalorder %s1078_s12, %s1599_s4 }
 0x264   :  { %p1084_p7 = pnand %p1082_p6, %p1079_p5 }
 0x266   :  { %1087 = shalt.err (!%p1084_p7)
}
 0x267   :  { %870 = dma.vmem_to_hbm [thread:$0]  %s868_s8, 16, %s1599_s4, [#allocation4]  }
 0x268   :  { %1088 = dma.done.wait [#allocation4], 16  }
 0x269   :  { %1089 = vsyncadd [#allocation4], 4294967280 }
 0x26a   :  { %874 = vsyncpa [#allocation4], 1 }

</bundles_post_ra>
